<compile_context>
chip_gen: v7x
topology: tpu7x:2x2x1
jax: 0.10.0
libtpu: 0.0.40
codegen_flags: <defaults>
</compile_context>

<pallas_src>
import functools

import numpy as np
import jax
import jax.numpy as jnp
from jax.experimental import pallas as pl
from jax.experimental.pallas import tpu as pltpu


_LRELU_GAIN = float(np.sqrt(2.0))   # bias_act def_gain for 'lrelu'
_LRELU_ALPHA = 0.2
_EPS = 1e-8


def _round_up(x, m):
    return -(-int(x) // int(m)) * int(m)


def _const_spec(shape):
    """BlockSpec for a grid-invariant (weight/bias) operand: constant index_map,
    single-buffered (nothing to double-buffer), so it stays resident in VMEM at
    half the cost.  Falls back to a plain spec on older JAX without pipeline_mode."""
    shape = tuple(int(s) for s in shape)
    n = len(shape)
    index_map = lambda i, _n=n: (0,) * _n
    try:
        return pl.BlockSpec(shape, index_map, pipeline_mode=pl.Buffered(buffer_count=1))
    except Exception:  # pipeline_mode / Buffered unavailable on this JAX version
        return pl.BlockSpec(shape, index_map)


def _choose_block_b(batch):
    """Batch tiling policy.
    - tiles are multiples of 8 sublanes (pad tiny batches up to 8),
    - batches >= 16 get at least two grid steps so ("parallel",) dimension
      semantics can shard across both v7x TensorCores,
    - tiles are capped at 512 rows: amortizes the ~0.35us per-grid-step overhead
      on v5e/v6e while keeping activation VMEM small."""
    bp = _round_up(max(int(batch), 1), 8)
    if bp < 16:
        return bp, bp
    block = min(512, _round_up(pl.cdiv(bp, 2), 8))
    return block, _round_up(bp, block)


# ----------------------------------------------------------------------------
# Fused mapping-network kernel
# ----------------------------------------------------------------------------
def _mapping_kernel(*refs, has_z, has_c, num_layers, packed_tail):
    # refs layout (inputs, then the single output):
    #   [z] [c, emb_w, emb_b] [w0z] [w0c] b0 {w_tail, b_tail | (w_l, b_l)*} out
    # Weights are pre-transposed ([in, out]), pre-scaled by their weight_gain and
    # stored as bfloat16; biases are pre-scaled by their bias_gain (float32).
    refs = list(refs)
    pos = 0

    def take():
        nonlocal pos
        r = refs[pos]
        pos += 1
        return r

    z_ref = take() if has_z else None
    if has_c:
        c_ref = take()
        emb_w_ref = take()
        emb_b_ref = take()
    w0z_ref = take() if has_z else None
    w0c_ref = take() if has_c else None
    b0_ref = take()
    tail = []
    if num_layers > 1:
        if packed_tail:
            w_st, b_st = take(), take()
            tail = [(w_st, b_st, l) for l in range(num_layers - 1)]
        else:
            for _ in range(num_layers - 1):
                tail.append((take(), take(), None))
    o_ref = take()

    def norm2(v):  # normalize_2nd_moment along the feature (lane) axis, f32
        return v * jax.lax.rsqrt(jnp.mean(v * v, axis=1, keepdims=True) + _EPS)

    def lrelu(h):
        return jnp.where(h >= 0.0, h, _LRELU_ALPHA * h) * _LRELU_GAIN

    # ---- input stage + layer 0 (split-K matmul over the z / embed(c) segments) ----
    h = None
    if has_z:
        zn = norm2(z_ref[...].astype(jnp.float32))
        h = jnp.dot(zn.astype(jnp.bfloat16), w0z_ref[...],
                    preferred_element_type=jnp.float32)
    if has_c:
        y = jnp.dot(c_ref[...].astype(jnp.bfloat16), emb_w_ref[...],
                    preferred_element_type=jnp.float32)
        y = norm2(y + emb_b_ref[...])
        part = jnp.dot(y.astype(jnp.bfloat16), w0c_ref[...],
                       preferred_element_type=jnp.float32)
        h = part if h is None else h + part
    x = lrelu(h + b0_ref[...])

    # ---- remaining layers: one bf16 MXU matmul + bias + lrelu each, all in vregs ----
    for (w_ref, b_ref, sl) in tail:
        w = w_ref[sl] if sl is not None else w_ref[...]
        b = b_ref[sl] if sl is not None else b_ref[...]
        hh = jnp.dot(x.astype(jnp.bfloat16), w,
                     preferred_element_type=jnp.float32) + b
        x = lrelu(hh)

    o_ref[...] = x.astype(o_ref.dtype)


# ----------------------------------------------------------------------------
# One-time parameter preparation (transpose / fold gains / cast / pack)
# ----------------------------------------------------------------------------
def prepare_mapping_params(params):
    """Transform torch-layout parameters into kernel-ready arrays ONCE at load time:
    transpose to [in, out], fold weight_gain and bias_gain, cast weights to bf16,
    split the layer-0 weight into its z / embed row blocks, and stack the
    equal-shaped tail layers into single arrays."""
    z_dim, c_dim = params['z_dim'], params['c_dim']
    num_layers = params['num_layers']
    lr = params['lr_multiplier']
    assert z_dim > 0 or c_dim > 0, "MappingNetwork needs z_dim > 0 or c_dim > 0"

    prep = dict(z_dim=z_dim, c_dim=c_dim, w_dim=params['w_dim'],
                num_ws=params['num_ws'], num_layers=num_layers,
                w_avg=params['w_avg'])

    if c_dim > 0:
        ew = params['embed']['weight']                     # [embed_features, c_dim]
        emb_feat = ew.shape[0]
        prep['emb_w'] = (jnp.transpose(ew) * (1.0 / np.sqrt(c_dim))).astype(jnp.bfloat16)
        prep['emb_b'] = params['embed']['bias'].reshape(1, emb_feat).astype(jnp.float32)
        prep['embed_features'] = emb_feat
    else:
        prep['embed_features'] = 0

    # layer 0: split its [in0, out0] weight into z-rows and embed-rows so the
    # kernel's split-K matmul never slices at a sublane-misaligned offset.
    w0 = params['fc'][0]['weight']                         # [out0, in0] (torch layout)
    out0, in0 = w0.shape
    g0 = float(lr / np.sqrt(in0))
    w0t = jnp.transpose(w0) * g0                           # [in0, out0], gain folded
    if z_dim > 0:
        prep['w0z'] = w0t[:z_dim].astype(jnp.bfloat16)
    if c_dim > 0:
        prep['w0c'] = w0t[z_dim:].astype(jnp.bfloat16)
    prep['b0'] = (params['fc'][0]['bias'] * lr).reshape(1, out0).astype(jnp.float32)

    tail_w, tail_b = [], []
    for l in range(1, num_layers):
        w = params['fc'][l]['weight']                      # [out, in]
        fout, fin = w.shape
        g = float(lr / np.sqrt(fin))
        tail_w.append((jnp.transpose(w) * g).astype(jnp.bfloat16))
        tail_b.append((params['fc'][l]['bias'] * lr).reshape(1, fout).astype(jnp.float32))

    packed = num_layers > 1 and all(w.shape == tail_w[0].shape for w in tail_w)
    prep['packed_tail'] = bool(packed)
    if packed:
        prep['w_tail'] = jnp.stack(tail_w)                 # [L-1, F, F]   bf16
        prep['b_tail'] = jnp.stack(tail_b)                 # [L-1, 1, F]   f32
    else:
        prep['w_tail_list'] = tail_w
        prep['b_tail_list'] = tail_b
    return prep


# ----------------------------------------------------------------------------
# Wrapper
# ----------------------------------------------------------------------------
def mapping_forward(prep, z, c, *, num_ws=None, truncation_psi=1.0,
                    truncation_cutoff=None):
    z_dim, c_dim, w_dim = prep['z_dim'], prep['c_dim'], prep['w_dim']
    num_layers = prep['num_layers']
    B = (z if z_dim > 0 else c).shape[0]

    block_b, B_pad = _choose_block_b(B)

    inputs, in_specs = [], []
    const_bytes = 0

    def add_const(arr):
        nonlocal const_bytes
        inputs.append(arr)
        in_specs.append(_const_spec(arr.shape))
        const_bytes += int(np.prod(arr.shape)) * arr.dtype.itemsize

    if z_dim > 0:
        zp = jnp.asarray(z, jnp.float32)
        if B_pad != B:
            zp = jnp.pad(zp, ((0, B_pad - B), (0, 0)))
        inputs.append(zp)
        in_specs.append(pl.BlockSpec((block_b, z_dim), lambda i: (i, 0)))
    if c_dim > 0:
        cp = jnp.asarray(c, jnp.float32)
        if B_pad != B:
            cp = jnp.pad(cp, ((0, B_pad - B), (0, 0)))
        inputs.append(cp)
        in_specs.append(pl.BlockSpec((block_b, c_dim), lambda i: (i, 0)))
        add_const(prep['emb_w'])
        add_const(prep['emb_b'])
    if z_dim > 0:
        add_const(prep['w0z'])
    if c_dim > 0:
        add_const(prep['w0c'])
    add_const(prep['b0'])
    if num_layers > 1:
        if prep['packed_tail']:
            add_const(prep['w_tail'])
            add_const(prep['b_tail'])
        else:
            for wl, bl in zip(prep['w_tail_list'], prep['b_tail_list']):
                add_const(wl)
                add_const(bl)

    # VMEM budget: resident weights (+safety factor) + double-buffered batch tiles
    # of input/output + headroom for the f32 activation temporaries.  Capped at
    # 64 MiB so it is valid on every generation (v7x has 64 MiB physical VMEM).
    io_bytes = block_b * (z_dim + c_dim + 2 * w_dim) * 4
    vmem_limit = int(min(max(2 * const_bytes + 4 * io_bytes + (8 << 20), 32 << 20),
                         64 << 20))

    kern = functools.partial(
        _mapping_kernel,
        has_z=z_dim > 0, has_c=c_dim > 0,
        num_layers=num_layers, packed_tail=prep['packed_tail'])

    out = pl.pallas_call(
        kern,
        out_shape=jax.ShapeDtypeStruct((B_pad, w_dim), jnp.float32),
        grid=(B_pad // block_b,),
        in_specs=in_specs,
        out_specs=pl.BlockSpec((block_b, w_dim), lambda i: (i, 0)),
        compiler_params=pltpu.CompilerParams(
            dimension_semantics=("parallel",),
            vmem_limit_bytes=vmem_limit),
    )(*inputs)

    x = out[:B]

    # broadcast to num_ws (cheap memory op at the JAX level)
    if num_ws is not None:
        x = jnp.broadcast_to(x[:, None, :], (B, num_ws, w_dim))

    # truncation (default truncation_psi=1 -> no-op)
    if truncation_psi != 1.0:
        w_avg = prep['w_avg']
        if num_ws is None or truncation_cutoff is None:
            x = w_avg + (x - w_avg) * truncation_psi
        else:
            head = w_avg + (x[:, :truncation_cutoff] - w_avg) * truncation_psi
            x = jnp.concatenate([head, x[:, truncation_cutoff:]], axis=1)

    # TODO(synk): update_emas (in-place EMA update of the w_avg buffer) is stateful
    # and not implemented in this functional forward pass.
    return x


# ----------------------------------------------------------------------------
# Parameter init (matches torch module __init__ shapes / scaling)
# ----------------------------------------------------------------------------
def init_mapping_params(key, z_dim, c_dim, w_dim, num_ws, num_layers=8,
                        embed_features=None, layer_features=None,
                        lr_multiplier=0.01):
    if embed_features is None:
        embed_features = w_dim
    if c_dim == 0:
        embed_features = 0
    if layer_features is None:
        layer_features = w_dim
    features = ([z_dim + embed_features]
                + [layer_features] * (num_layers - 1) + [w_dim])

    params = dict(z_dim=z_dim, c_dim=c_dim, w_dim=w_dim, num_ws=num_ws,
                  num_layers=num_layers, lr_multiplier=float(lr_multiplier))
    keys = jax.random.split(key, num_layers + 1)

    if c_dim > 0:
        params['embed'] = dict(
            weight=jax.random.normal(keys[0], (embed_features, c_dim), jnp.float32),
            bias=jnp.zeros((embed_features,), jnp.float32))

    fc = []
    for l in range(num_layers):
        fc.append(dict(
            # torch: weight = randn([out, in]) / lr_multiplier, bias = zeros
            weight=jax.random.normal(keys[l + 1],
                                     (features[l + 1], features[l]),
                                     jnp.float32) / lr_multiplier,
            bias=jnp.zeros((features[l + 1],), jnp.float32)))
    params['fc'] = fc
    params['w_avg'] = jnp.zeros((w_dim,), jnp.float32)
    return params


# ----------------------------------------------------------------------------
# Pure-JAX reference (for correctness check)
# ----------------------------------------------------------------------------
def _reference_forward(params, z, c, *, num_ws, bf16_matmuls=False):
    """Ground-truth forward.  With bf16_matmuls=True it rounds every matmul operand
    to bfloat16 (f32 accumulate), i.e. an exact semantic model of the kernel."""
    hp = jax.lax.Precision.HIGHEST

    def cast(a):
        return a.astype(jnp.bfloat16).astype(jnp.float32) if bf16_matmuls else a

    def norm2(v):
        return v * jax.lax.rsqrt(jnp.mean(v * v, axis=1, keepdims=True) + _EPS)

    x = None
    if params['z_dim'] > 0:
        x = norm2(z.astype(jnp.float32))
    if params['c_dim'] > 0:
        ew = params['embed']['weight'] * (1.0 / np.sqrt(params['c_dim']))
        eb = params['embed']['bias']
        y = jnp.matmul(cast(c.astype(jnp.float32)), cast(ew.T), precision=hp) + eb
        y = norm2(y)
        x = jnp.concatenate([x, y], axis=1) if x is not None else y
    lr = params['lr_multiplier']
    for l in range(params['num_layers']):
        w = params['fc'][l]['weight']
        b = params['fc'][l]['bias']
        g = lr / np.sqrt(w.shape[1])
        h = jnp.matmul(cast(x), cast((w * g).T), precision=hp) + b * lr
        x = jnp.where(h >= 0, h, _LRELU_ALPHA * h) * _LRELU_GAIN
    if num_ws is None:
        return x
    return jnp.broadcast_to(x[:, None, :], (x.shape[0], num_ws, x.shape[1]))


if __name__ == "__main__":
    key = jax.random.PRNGKey(0)
    kp, kz, kc = jax.random.split(key, 3)

    z_dim, c_dim, w_dim, num_ws = 32, 8, 32, 10
    batch = 2
    params = init_mapping_params(kp, z_dim, c_dim, w_dim, num_ws, num_layers=8)
    prep = prepare_mapping_params(params)   # one-time: transpose / fold gains / bf16 / pack

    z = jax.random.normal(kz, (batch, z_dim), jnp.float32)
    c = jax.random.normal(kc, (batch, c_dim), jnp.float32)

    ws = mapping_forward(prep, z, c, num_ws=num_ws)
    ws = jax.block_until_ready(ws)

    assert ws.shape == (batch, num_ws, w_dim), ws.shape
    assert ws.dtype == jnp.float32
    assert bool(jnp.all(jnp.isfinite(ws)))

    # Tight check against an exact semantic model of the kernel (bf16 matmul
    # operands, f32 accumulate) -- only accumulation order differs.
    ref_bf16 = _reference_forward(params, z, c, num_ws=num_ws, bf16_matmuls=True)
    err = float(jnp.max(jnp.abs(ws - ref_bf16)))
    assert np.isfinite(err) and err < 5e-3, f"max abs err vs bf16-emulated ref: {err}"

    # Looser sanity check against the full-f32 reference (bf16 weights/activations
    # introduce ~1% relative error over 8 layers).
    ref_f32 = _reference_forward(params, z, c, num_ws=num_ws, bf16_matmuls=False)
    rel = float(jnp.linalg.norm(ws - ref_f32) / (jnp.linalg.norm(ref_f32) + 1e-12))
    assert np.isfinite(rel) and rel < 0.05, f"relative L2 err vs f32 ref: {rel}"

    print("KERNEL_OK")
</pallas_src>

<mosaic_0001>
module attributes {stable_mosaic.version = 11 : i64} {
  func.func @_mapping_kernel(%arg0: i32, %arg1: memref<8x32xf32, #tpu.memory_space<vmem>>, %arg2: memref<8x8xf32, #tpu.memory_space<vmem>>, %arg3: memref<8x32xbf16, #tpu.memory_space<vmem>>, %arg4: memref<1x32xf32, #tpu.memory_space<vmem>>, %arg5: memref<32x32xbf16, #tpu.memory_space<vmem>>, %arg6: memref<32x32xbf16, #tpu.memory_space<vmem>>, %arg7: memref<1x32xf32, #tpu.memory_space<vmem>>, %arg8: memref<7x32x32xbf16, #tpu.memory_space<vmem>>, %arg9: memref<7x1x32xf32, #tpu.memory_space<vmem>>, %arg10: memref<8x32xf32, #tpu.memory_space<vmem>>) attributes {dimension_semantics = [#tpu.dimension_semantics<parallel>], iteration_bounds = array<i64: 1>, scalar_prefetch = 0 : i64, scratch_operands = 0 : i64, tpu.core_type = #tpu.core_type<tc>, window_params = [{transform_indices = @transform_0, window_bounds = array<i64: 8, 32>}, {transform_indices = @transform_1, window_bounds = array<i64: 8, 8>}, {pipeline_mode = #tpu.pipeline_mode<synchronous>, transform_indices = @transform_2, window_bounds = array<i64: 8, 32>}, {pipeline_mode = #tpu.pipeline_mode<synchronous>, transform_indices = @transform_3, window_bounds = array<i64: 1, 32>}, {pipeline_mode = #tpu.pipeline_mode<synchronous>, transform_indices = @transform_4, window_bounds = array<i64: 32, 32>}, {pipeline_mode = #tpu.pipeline_mode<synchronous>, transform_indices = @transform_5, window_bounds = array<i64: 32, 32>}, {pipeline_mode = #tpu.pipeline_mode<synchronous>, transform_indices = @transform_6, window_bounds = array<i64: 1, 32>}, {pipeline_mode = #tpu.pipeline_mode<synchronous>, transform_indices = @transform_7, window_bounds = array<i64: 7, 32, 32>}, {pipeline_mode = #tpu.pipeline_mode<synchronous>, transform_indices = @transform_8, window_bounds = array<i64: 7, 1, 32>}, {transform_indices = @transform_9, window_bounds = array<i64: 8, 32>}]} {
    %c0 = arith.constant 0 : index
    %c0_0 = arith.constant 0 : index
    %0 = vector.load %arg1[%c0, %c0_0] : memref<8x32xf32, #tpu.memory_space<vmem>>, vector<8x32xf32>
    %1 = arith.mulf %0, %0 : vector<8x32xf32>
    %cst = arith.constant dense<0.000000e+00> : vector<8xf32>
    %2 = vector.multi_reduction <add>, %1, %cst [1] : vector<8x32xf32> to vector<8xf32>
    %3 = vector.shape_cast %2 : vector<8xf32> to vector<8x1xf32>
    %cst_1 = arith.constant 3.200000e+01 : f32
    %4 = vector.broadcast %cst_1 : f32 to vector<8x1xf32>
    %5 = arith.divf %3, %4 : vector<8x1xf32>
    %cst_2 = arith.constant 9.99999993E-9 : f32
    %6 = vector.broadcast %cst_2 : f32 to vector<8x1xf32>
    %7 = arith.addf %5, %6 : vector<8x1xf32>
    %8 = math.rsqrt %7 : vector<8x1xf32>
    %9 = vector.broadcast %8 : vector<8x1xf32> to vector<8x32xf32>
    %10 = arith.mulf %0, %9 : vector<8x32xf32>
    %11 = arith.truncf %10 : vector<8x32xf32> to vector<8x32xbf16>
    %c0_3 = arith.constant 0 : index
    %c0_4 = arith.constant 0 : index
    %12 = vector.load %arg5[%c0_3, %c0_4] : memref<32x32xbf16, #tpu.memory_space<vmem>>, vector<32x32xbf16>
    %cst_5 = arith.constant dense<0.000000e+00> : vector<8x32xf32>
    %13 = tpu.matmul %11, %12, %cst_5 {dimension_numbers = #tpu.dot_dimension_numbers<[1], [0], [0], [1], [0, 0, 1, 1], [], []>} : vector<8x32xbf16>, vector<32x32xbf16>, vector<8x32xf32> -> vector<8x32xf32>
    %c0_6 = arith.constant 0 : index
    %c0_7 = arith.constant 0 : index
    %14 = vector.load %arg2[%c0_6, %c0_7] : memref<8x8xf32, #tpu.memory_space<vmem>>, vector<8x8xf32>
    %15 = arith.truncf %14 : vector<8x8xf32> to vector<8x8xbf16>
    %c0_8 = arith.constant 0 : index
    %c0_9 = arith.constant 0 : index
    %16 = vector.load %arg3[%c0_8, %c0_9] : memref<8x32xbf16, #tpu.memory_space<vmem>>, vector<8x32xbf16>
    %cst_10 = arith.constant dense<0.000000e+00> : vector<8x32xf32>
    %17 = tpu.matmul %15, %16, %cst_10 {dimension_numbers = #tpu.dot_dimension_numbers<[1], [0], [0], [1], [0, 0, 1, 1], [], []>} : vector<8x8xbf16>, vector<8x32xbf16>, vector<8x32xf32> -> vector<8x32xf32>
    %c0_11 = arith.constant 0 : index
    %c0_12 = arith.constant 0 : index
    %18 = vector.load %arg4[%c0_11, %c0_12] : memref<1x32xf32, #tpu.memory_space<vmem>>, vector<1x32xf32>
    %19 = vector.broadcast %18 : vector<1x32xf32> to vector<8x32xf32>
    %20 = arith.addf %17, %19 : vector<8x32xf32>
    %21 = arith.mulf %20, %20 : vector<8x32xf32>
    %cst_13 = arith.constant dense<0.000000e+00> : vector<8xf32>
    %22 = vector.multi_reduction <add>, %21, %cst_13 [1] : vector<8x32xf32> to vector<8xf32>
    %23 = vector.shape_cast %22 : vector<8xf32> to vector<8x1xf32>
    %cst_14 = arith.constant 3.200000e+01 : f32
    %24 = vector.broadcast %cst_14 : f32 to vector<8x1xf32>
    %25 = arith.divf %23, %24 : vector<8x1xf32>
    %cst_15 = arith.constant 9.99999993E-9 : f32
    %26 = vector.broadcast %cst_15 : f32 to vector<8x1xf32>
    %27 = arith.addf %25, %26 : vector<8x1xf32>
    %28 = math.rsqrt %27 : vector<8x1xf32>
    %29 = vector.broadcast %28 : vector<8x1xf32> to vector<8x32xf32>
    %30 = arith.mulf %20, %29 : vector<8x32xf32>
    %31 = arith.truncf %30 : vector<8x32xf32> to vector<8x32xbf16>
    %c0_16 = arith.constant 0 : index
    %c0_17 = arith.constant 0 : index
    %32 = vector.load %arg6[%c0_16, %c0_17] : memref<32x32xbf16, #tpu.memory_space<vmem>>, vector<32x32xbf16>
    %cst_18 = arith.constant dense<0.000000e+00> : vector<8x32xf32>
    %33 = tpu.matmul %31, %32, %cst_18 {dimension_numbers = #tpu.dot_dimension_numbers<[1], [0], [0], [1], [0, 0, 1, 1], [], []>} : vector<8x32xbf16>, vector<32x32xbf16>, vector<8x32xf32> -> vector<8x32xf32>
    %34 = arith.addf %13, %33 : vector<8x32xf32>
    %c0_19 = arith.constant 0 : index
    %c0_20 = arith.constant 0 : index
    %35 = vector.load %arg7[%c0_19, %c0_20] : memref<1x32xf32, #tpu.memory_space<vmem>>, vector<1x32xf32>
    %36 = vector.broadcast %35 : vector<1x32xf32> to vector<8x32xf32>
    %37 = arith.addf %34, %36 : vector<8x32xf32>
    %cst_21 = arith.constant 0.000000e+00 : f32
    %38 = vector.broadcast %cst_21 : f32 to vector<8x32xf32>
    %39 = arith.cmpf oge, %37, %38 : vector<8x32xf32>
    %cst_22 = arith.constant 2.000000e-01 : f32
    %40 = vector.broadcast %cst_22 : f32 to vector<8x32xf32>
    %41 = arith.mulf %40, %37 : vector<8x32xf32>
    %42 = arith.select %39, %37, %41 : vector<8x32xi1>, vector<8x32xf32>
    %cst_23 = arith.constant 1.41421354 : f32
    %43 = vector.broadcast %cst_23 : f32 to vector<8x32xf32>
    %44 = arith.mulf %42, %43 : vector<8x32xf32>
    %c0_24 = arith.constant 0 : index
    %c0_25 = arith.constant 0 : index
    %c0_26 = arith.constant 0 : index
    %45 = vector.load %arg8[%c0_24, %c0_25, %c0_26] : memref<7x32x32xbf16, #tpu.memory_space<vmem>>, vector<1x32x32xbf16>
    %46 = vector.shape_cast %45 : vector<1x32x32xbf16> to vector<32x32xbf16>
    %c0_27 = arith.constant 0 : index
    %c0_28 = arith.constant 0 : index
    %c0_29 = arith.constant 0 : index
    %47 = vector.load %arg9[%c0_27, %c0_28, %c0_29] : memref<7x1x32xf32, #tpu.memory_space<vmem>>, vector<1x1x32xf32>
    %48 = vector.shape_cast %47 : vector<1x1x32xf32> to vector<1x32xf32>
    %49 = arith.truncf %44 : vector<8x32xf32> to vector<8x32xbf16>
    %cst_30 = arith.constant dense<0.000000e+00> : vector<8x32xf32>
    %50 = tpu.matmul %49, %46, %cst_30 {dimension_numbers = #tpu.dot_dimension_numbers<[1], [0], [0], [1], [0, 0, 1, 1], [], []>} : vector<8x32xbf16>, vector<32x32xbf16>, vector<8x32xf32> -> vector<8x32xf32>
    %51 = vector.broadcast %48 : vector<1x32xf32> to vector<8x32xf32>
    %52 = arith.addf %50, %51 : vector<8x32xf32>
    %cst_31 = arith.constant 0.000000e+00 : f32
    %53 = vector.broadcast %cst_31 : f32 to vector<8x32xf32>
    %54 = arith.cmpf oge, %52, %53 : vector<8x32xf32>
    %cst_32 = arith.constant 2.000000e-01 : f32
    %55 = vector.broadcast %cst_32 : f32 to vector<8x32xf32>
    %56 = arith.mulf %55, %52 : vector<8x32xf32>
    %57 = arith.select %54, %52, %56 : vector<8x32xi1>, vector<8x32xf32>
    %cst_33 = arith.constant 1.41421354 : f32
    %58 = vector.broadcast %cst_33 : f32 to vector<8x32xf32>
    %59 = arith.mulf %57, %58 : vector<8x32xf32>
    %c1 = arith.constant 1 : index
    %c0_34 = arith.constant 0 : index
    %c0_35 = arith.constant 0 : index
    %60 = vector.load %arg8[%c1, %c0_34, %c0_35] : memref<7x32x32xbf16, #tpu.memory_space<vmem>>, vector<1x32x32xbf16>
    %61 = vector.shape_cast %60 : vector<1x32x32xbf16> to vector<32x32xbf16>
    %c1_36 = arith.constant 1 : index
    %c0_37 = arith.constant 0 : index
    %c0_38 = arith.constant 0 : index
    %62 = vector.load %arg9[%c1_36, %c0_37, %c0_38] : memref<7x1x32xf32, #tpu.memory_space<vmem>>, vector<1x1x32xf32>
    %63 = vector.shape_cast %62 : vector<1x1x32xf32> to vector<1x32xf32>
    %64 = arith.truncf %59 : vector<8x32xf32> to vector<8x32xbf16>
    %cst_39 = arith.constant dense<0.000000e+00> : vector<8x32xf32>
    %65 = tpu.matmul %64, %61, %cst_39 {dimension_numbers = #tpu.dot_dimension_numbers<[1], [0], [0], [1], [0, 0, 1, 1], [], []>} : vector<8x32xbf16>, vector<32x32xbf16>, vector<8x32xf32> -> vector<8x32xf32>
    %66 = vector.broadcast %63 : vector<1x32xf32> to vector<8x32xf32>
    %67 = arith.addf %65, %66 : vector<8x32xf32>
    %cst_40 = arith.constant 0.000000e+00 : f32
    %68 = vector.broadcast %cst_40 : f32 to vector<8x32xf32>
    %69 = arith.cmpf oge, %67, %68 : vector<8x32xf32>
    %cst_41 = arith.constant 2.000000e-01 : f32
    %70 = vector.broadcast %cst_41 : f32 to vector<8x32xf32>
    %71 = arith.mulf %70, %67 : vector<8x32xf32>
    %72 = arith.select %69, %67, %71 : vector<8x32xi1>, vector<8x32xf32>
    %cst_42 = arith.constant 1.41421354 : f32
    %73 = vector.broadcast %cst_42 : f32 to vector<8x32xf32>
    %74 = arith.mulf %72, %73 : vector<8x32xf32>
    %c2 = arith.constant 2 : index
    %c0_43 = arith.constant 0 : index
    %c0_44 = arith.constant 0 : index
    %75 = vector.load %arg8[%c2, %c0_43, %c0_44] : memref<7x32x32xbf16, #tpu.memory_space<vmem>>, vector<1x32x32xbf16>
    %76 = vector.shape_cast %75 : vector<1x32x32xbf16> to vector<32x32xbf16>
    %c2_45 = arith.constant 2 : index
    %c0_46 = arith.constant 0 : index
    %c0_47 = arith.constant 0 : index
    %77 = vector.load %arg9[%c2_45, %c0_46, %c0_47] : memref<7x1x32xf32, #tpu.memory_space<vmem>>, vector<1x1x32xf32>
    %78 = vector.shape_cast %77 : vector<1x1x32xf32> to vector<1x32xf32>
    %79 = arith.truncf %74 : vector<8x32xf32> to vector<8x32xbf16>
    %cst_48 = arith.constant dense<0.000000e+00> : vector<8x32xf32>
    %80 = tpu.matmul %79, %76, %cst_48 {dimension_numbers = #tpu.dot_dimension_numbers<[1], [0], [0], [1], [0, 0, 1, 1], [], []>} : vector<8x32xbf16>, vector<32x32xbf16>, vector<8x32xf32> -> vector<8x32xf32>
    %81 = vector.broadcast %78 : vector<1x32xf32> to vector<8x32xf32>
    %82 = arith.addf %80, %81 : vector<8x32xf32>
    %cst_49 = arith.constant 0.000000e+00 : f32
    %83 = vector.broadcast %cst_49 : f32 to vector<8x32xf32>
    %84 = arith.cmpf oge, %82, %83 : vector<8x32xf32>
    %cst_50 = arith.constant 2.000000e-01 : f32
    %85 = vector.broadcast %cst_50 : f32 to vector<8x32xf32>
    %86 = arith.mulf %85, %82 : vector<8x32xf32>
    %87 = arith.select %84, %82, %86 : vector<8x32xi1>, vector<8x32xf32>
    %cst_51 = arith.constant 1.41421354 : f32
    %88 = vector.broadcast %cst_51 : f32 to vector<8x32xf32>
    %89 = arith.mulf %87, %88 : vector<8x32xf32>
    %c3 = arith.constant 3 : index
    %c0_52 = arith.constant 0 : index
    %c0_53 = arith.constant 0 : index
    %90 = vector.load %arg8[%c3, %c0_52, %c0_53] : memref<7x32x32xbf16, #tpu.memory_space<vmem>>, vector<1x32x32xbf16>
    %91 = vector.shape_cast %90 : vector<1x32x32xbf16> to vector<32x32xbf16>
    %c3_54 = arith.constant 3 : index
    %c0_55 = arith.constant 0 : index
    %c0_56 = arith.constant 0 : index
    %92 = vector.load %arg9[%c3_54, %c0_55, %c0_56] : memref<7x1x32xf32, #tpu.memory_space<vmem>>, vector<1x1x32xf32>
    %93 = vector.shape_cast %92 : vector<1x1x32xf32> to vector<1x32xf32>
    %94 = arith.truncf %89 : vector<8x32xf32> to vector<8x32xbf16>
    %cst_57 = arith.constant dense<0.000000e+00> : vector<8x32xf32>
    %95 = tpu.matmul %94, %91, %cst_57 {dimension_numbers = #tpu.dot_dimension_numbers<[1], [0], [0], [1], [0, 0, 1, 1], [], []>} : vector<8x32xbf16>, vector<32x32xbf16>, vector<8x32xf32> -> vector<8x32xf32>
    %96 = vector.broadcast %93 : vector<1x32xf32> to vector<8x32xf32>
    %97 = arith.addf %95, %96 : vector<8x32xf32>
    %cst_58 = arith.constant 0.000000e+00 : f32
    %98 = vector.broadcast %cst_58 : f32 to vector<8x32xf32>
    %99 = arith.cmpf oge, %97, %98 : vector<8x32xf32>
    %cst_59 = arith.constant 2.000000e-01 : f32
    %100 = vector.broadcast %cst_59 : f32 to vector<8x32xf32>
    %101 = arith.mulf %100, %97 : vector<8x32xf32>
    %102 = arith.select %99, %97, %101 : vector<8x32xi1>, vector<8x32xf32>
    %cst_60 = arith.constant 1.41421354 : f32
    %103 = vector.broadcast %cst_60 : f32 to vector<8x32xf32>
    %104 = arith.mulf %102, %103 : vector<8x32xf32>
    %c4 = arith.constant 4 : index
    %c0_61 = arith.constant 0 : index
    %c0_62 = arith.constant 0 : index
    %105 = vector.load %arg8[%c4, %c0_61, %c0_62] : memref<7x32x32xbf16, #tpu.memory_space<vmem>>, vector<1x32x32xbf16>
    %106 = vector.shape_cast %105 : vector<1x32x32xbf16> to vector<32x32xbf16>
    %c4_63 = arith.constant 4 : index
    %c0_64 = arith.constant 0 : index
    %c0_65 = arith.constant 0 : index
    %107 = vector.load %arg9[%c4_63, %c0_64, %c0_65] : memref<7x1x32xf32, #tpu.memory_space<vmem>>, vector<1x1x32xf32>
    %108 = vector.shape_cast %107 : vector<1x1x32xf32> to vector<1x32xf32>
    %109 = arith.truncf %104 : vector<8x32xf32> to vector<8x32xbf16>
    %cst_66 = arith.constant dense<0.000000e+00> : vector<8x32xf32>
    %110 = tpu.matmul %109, %106, %cst_66 {dimension_numbers = #tpu.dot_dimension_numbers<[1], [0], [0], [1], [0, 0, 1, 1], [], []>} : vector<8x32xbf16>, vector<32x32xbf16>, vector<8x32xf32> -> vector<8x32xf32>
    %111 = vector.broadcast %108 : vector<1x32xf32> to vector<8x32xf32>
    %112 = arith.addf %110, %111 : vector<8x32xf32>
    %cst_67 = arith.constant 0.000000e+00 : f32
    %113 = vector.broadcast %cst_67 : f32 to vector<8x32xf32>
    %114 = arith.cmpf oge, %112, %113 : vector<8x32xf32>
    %cst_68 = arith.constant 2.000000e-01 : f32
    %115 = vector.broadcast %cst_68 : f32 to vector<8x32xf32>
    %116 = arith.mulf %115, %112 : vector<8x32xf32>
    %117 = arith.select %114, %112, %116 : vector<8x32xi1>, vector<8x32xf32>
    %cst_69 = arith.constant 1.41421354 : f32
    %118 = vector.broadcast %cst_69 : f32 to vector<8x32xf32>
    %119 = arith.mulf %117, %118 : vector<8x32xf32>
    %c5 = arith.constant 5 : index
    %c0_70 = arith.constant 0 : index
    %c0_71 = arith.constant 0 : index
    %120 = vector.load %arg8[%c5, %c0_70, %c0_71] : memref<7x32x32xbf16, #tpu.memory_space<vmem>>, vector<1x32x32xbf16>
    %121 = vector.shape_cast %120 : vector<1x32x32xbf16> to vector<32x32xbf16>
    %c5_72 = arith.constant 5 : index
    %c0_73 = arith.constant 0 : index
    %c0_74 = arith.constant 0 : index
    %122 = vector.load %arg9[%c5_72, %c0_73, %c0_74] : memref<7x1x32xf32, #tpu.memory_space<vmem>>, vector<1x1x32xf32>
    %123 = vector.shape_cast %122 : vector<1x1x32xf32> to vector<1x32xf32>
    %124 = arith.truncf %119 : vector<8x32xf32> to vector<8x32xbf16>
    %cst_75 = arith.constant dense<0.000000e+00> : vector<8x32xf32>
    %125 = tpu.matmul %124, %121, %cst_75 {dimension_numbers = #tpu.dot_dimension_numbers<[1], [0], [0], [1], [0, 0, 1, 1], [], []>} : vector<8x32xbf16>, vector<32x32xbf16>, vector<8x32xf32> -> vector<8x32xf32>
    %126 = vector.broadcast %123 : vector<1x32xf32> to vector<8x32xf32>
    %127 = arith.addf %125, %126 : vector<8x32xf32>
    %cst_76 = arith.constant 0.000000e+00 : f32
    %128 = vector.broadcast %cst_76 : f32 to vector<8x32xf32>
    %129 = arith.cmpf oge, %127, %128 : vector<8x32xf32>
    %cst_77 = arith.constant 2.000000e-01 : f32
    %130 = vector.broadcast %cst_77 : f32 to vector<8x32xf32>
    %131 = arith.mulf %130, %127 : vector<8x32xf32>
    %132 = arith.select %129, %127, %131 : vector<8x32xi1>, vector<8x32xf32>
    %cst_78 = arith.constant 1.41421354 : f32
    %133 = vector.broadcast %cst_78 : f32 to vector<8x32xf32>
    %134 = arith.mulf %132, %133 : vector<8x32xf32>
    %c6 = arith.constant 6 : index
    %c0_79 = arith.constant 0 : index
    %c0_80 = arith.constant 0 : index
    %135 = vector.load %arg8[%c6, %c0_79, %c0_80] : memref<7x32x32xbf16, #tpu.memory_space<vmem>>, vector<1x32x32xbf16>
    %136 = vector.shape_cast %135 : vector<1x32x32xbf16> to vector<32x32xbf16>
    %c6_81 = arith.constant 6 : index
    %c0_82 = arith.constant 0 : index
    %c0_83 = arith.constant 0 : index
    %137 = vector.load %arg9[%c6_81, %c0_82, %c0_83] : memref<7x1x32xf32, #tpu.memory_space<vmem>>, vector<1x1x32xf32>
    %138 = vector.shape_cast %137 : vector<1x1x32xf32> to vector<1x32xf32>
    %139 = arith.truncf %134 : vector<8x32xf32> to vector<8x32xbf16>
    %cst_84 = arith.constant dense<0.000000e+00> : vector<8x32xf32>
    %140 = tpu.matmul %139, %136, %cst_84 {dimension_numbers = #tpu.dot_dimension_numbers<[1], [0], [0], [1], [0, 0, 1, 1], [], []>} : vector<8x32xbf16>, vector<32x32xbf16>, vector<8x32xf32> -> vector<8x32xf32>
    %141 = vector.broadcast %138 : vector<1x32xf32> to vector<8x32xf32>
    %142 = arith.addf %140, %141 : vector<8x32xf32>
    %cst_85 = arith.constant 0.000000e+00 : f32
    %143 = vector.broadcast %cst_85 : f32 to vector<8x32xf32>
    %144 = arith.cmpf oge, %142, %143 : vector<8x32xf32>
    %cst_86 = arith.constant 2.000000e-01 : f32
    %145 = vector.broadcast %cst_86 : f32 to vector<8x32xf32>
    %146 = arith.mulf %145, %142 : vector<8x32xf32>
    %147 = arith.select %144, %142, %146 : vector<8x32xi1>, vector<8x32xf32>
    %cst_87 = arith.constant 1.41421354 : f32
    %148 = vector.broadcast %cst_87 : f32 to vector<8x32xf32>
    %149 = arith.mulf %147, %148 : vector<8x32xf32>
    %c0_88 = arith.constant 0 : index
    %c0_89 = arith.constant 0 : index
    %150 = vector.load %arg10[%c0_88, %c0_89] : memref<8x32xf32, #tpu.memory_space<vmem>>, vector<8x32xf32>
    tpu.vector_store %arg10[%c0_88, %c0_89], %149 {strides = array<i32>} : memref<8x32xf32, #tpu.memory_space<vmem>>, vector<8x32xf32>,
    return
  }
  func.func @transform_0(%arg0: i32) -> (i32, i32) {
    %c0_i32 = arith.constant 0 : i32
    %c0_i32_0 = arith.constant 0 : i32
    return %arg0, %c0_i32 : i32, i32
  }
  func.func @transform_1(%arg0: i32) -> (i32, i32) {
    %c0_i32 = arith.constant 0 : i32
    %c0_i32_0 = arith.constant 0 : i32
    return %arg0, %c0_i32 : i32, i32
  }
  func.func @transform_2(%arg0: i32) -> (i32, i32) {
    %c0_i32 = arith.constant 0 : i32
    %c0_i32_0 = arith.constant 0 : i32
    %c0_i32_1 = arith.constant 0 : i32
    return %c0_i32, %c0_i32_0 : i32, i32
  }
  func.func @transform_3(%arg0: i32) -> (i32, i32) {
    %c0_i32 = arith.constant 0 : i32
    %c0_i32_0 = arith.constant 0 : i32
    %c0_i32_1 = arith.constant 0 : i32
    return %c0_i32, %c0_i32_0 : i32, i32
  }
  func.func @transform_4(%arg0: i32) -> (i32, i32) {
    %c0_i32 = arith.constant 0 : i32
    %c0_i32_0 = arith.constant 0 : i32
    %c0_i32_1 = arith.constant 0 : i32
    return %c0_i32, %c0_i32_0 : i32, i32
  }
  func.func @transform_5(%arg0: i32) -> (i32, i32) {
    %c0_i32 = arith.constant 0 : i32
    %c0_i32_0 = arith.constant 0 : i32
    %c0_i32_1 = arith.constant 0 : i32
    return %c0_i32, %c0_i32_0 : i32, i32
  }
  func.func @transform_6(%arg0: i32) -> (i32, i32) {
    %c0_i32 = arith.constant 0 : i32
    %c0_i32_0 = arith.constant 0 : i32
    %c0_i32_1 = arith.constant 0 : i32
    return %c0_i32, %c0_i32_0 : i32, i32
  }
  func.func @transform_7(%arg0: i32) -> (i32, i32, i32) {
    %c0_i32 = arith.constant 0 : i32
    %c0_i32_0 = arith.constant 0 : i32
    %c0_i32_1 = arith.constant 0 : i32
    %c0_i32_2 = arith.constant 0 : i32
    return %c0_i32, %c0_i32_0, %c0_i32_1 : i32, i32, i32
  }
  func.func @transform_8(%arg0: i32) -> (i32, i32, i32) {
    %c0_i32 = arith.constant 0 : i32
    %c0_i32_0 = arith.constant 0 : i32
    %c0_i32_1 = arith.constant 0 : i32
    %c0_i32_2 = arith.constant 0 : i32
    return %c0_i32, %c0_i32_0, %c0_i32_1 : i32, i32, i32
  }
  func.func @transform_9(%arg0: i32) -> (i32, i32) {
    %c0_i32 = arith.constant 0 : i32
    %c0_i32_0 = arith.constant 0 : i32
    return %arg0, %c0_i32 : i32, i32
  }
}

</mosaic_0001>

<bundles_post_ra>
// kernel: tpu_custom_call.1
= control target key start
LH: loop header
LB: loop body
LE: loop exit
PB: predicated region body
PF: predicated region fallthrough
CT: control target
= control target key end

     0   :  { %14 = vsyncpa [#allocation3], 0  ;;  %s1383_s0 = inlined_call_operand.hbm [shape: f32[8,32], index: 0, kind: input, shape index: {}]   ;;  %s1384_s1 = inlined_call_operand.hbm [shape: f32[8,8], index: 1, kind: input, shape index: {}]   ;;  %s1385_s2 = inlined_call_operand.hbm [shape: bf16[8,32], index: 2, kind: input, shape index: {}]   ;;  %s1386_s3 = inlined_call_operand.vmem [shape: f32[1,32], index: 3, kind: input, shape index: {}]   ;;  %s1387_s4 = inlined_call_operand.hbm [shape: bf16[32,32], index: 4, kind: input, shape index: {}]   ;;  %s1388_s5 = inlined_call_operand.vmem [shape: bf16[32,32], index: 5, kind: input, shape index: {}]   ;;  %s1389_s6 = inlined_call_operand.vmem [shape: f32[1,32], index: 6, kind: input, shape index: {}]   ;;  %s1390_s7 = inlined_call_operand.hbm [shape: bf16[7,32,32], index: 7, kind: input, shape index: {}]   ;;  %s1391_s8 = inlined_call_operand.vmem [shape: f32[7,1,32], index: 8, kind: input, shape index: {}]   ;;  %s1392_s9 = inlined_call_operand.hbm [shape: f32[8,32], index: 9, kind: output, shape index: {}]  }
   0x1   :  { %15 = vsyncpa [#allocation6], 0 }
   0x2   :  { %16 = vsyncpa [#allocation9], 0 }
   0x3   :  { %17 = vsyncpa [#allocation4], 0  ;;  %s1154_s30 = smov [#allocation5]   ;;  %s1155_s11 = smov [#allocation8]  }
   0x4   :  { %s34_s10 = sshll.u32 %s1154_s30, 4  ;;  %s55_s12 = sshll.u32 %s1155_s11, 4  ;;  %s35_s10 = int_to_ptr.vmem [resolvable:$true] %s34_s10  ;;  %s1214_s12 = int_to_ptr.vmem [resolvable:$true] %s55_s12 }
   0x5   :  { %s1014_s15 = scalar_lea.hbm %s1384_s1, 128 }
   0x6   :  { %p1015_p0 = scmp.ne.s32.totalorder %s1384_s1, %s1014_s15  ;;  %p1018_p1 = scmp.lt.u32.totalorder %s1014_s15, %s1384_s1 }
   0x8   :  { %p1020_p2 = pnand %p1018_p1, %p1015_p0 }
   0xa   :  { %1023 = shalt.err (!%p1020_p2)
}
   0xb   :  { %s1024_s20 = scalar_lea.vmem %s35_s10, 128  ;;  %p1029_p4 = scmp.lt.s32.totalorder %s35_s10, %s35_s10 }
   0xc   :  { %p1025_p3 = scmp.ne.s32.totalorder %s35_s10, %s1024_s20  ;;  %p1030_p5 = scmp.lt.s32.totalorder %s1024_s20, %s1024_s20 }
   0xe   :  { %p1031_p6 = por %p1030_p5, %p1029_p4 }
  0x10   :  { %p1032_p7 = pnand %p1031_p6, %p1025_p3 }
  0x12   :  { %1035 = shalt.err (!%p1032_p7)
}
  0x13   :  { %37 = dma.hbm_to_vmem [thread:$0]  %s1384_s1, 128, %s35_s10, [#allocation6]  }
  0x14   :  { %s1036_s25 = scalar_lea.hbm %s1387_s4, 256 }
  0x15   :  { %p1037_p8 = scmp.ne.s32.totalorder %s1387_s4, %s1036_s25  ;;  %p1040_p9 = scmp.lt.u32.totalorder %s1036_s25, %s1387_s4 }
  0x17   :  { %p1042_p10 = pnand %p1040_p9, %p1037_p8 }
  0x19   :  { %1045 = shalt.err (!%p1042_p10)
}
  0x1a   :  { %s1046_s30 = scalar_lea.vmem %s1214_s12, 256  ;;  %p1051_p12 = scmp.lt.s32.totalorder %s1214_s12, %s1214_s12 }
  0x1b   :  { %p1047_p11 = scmp.ne.s32.totalorder %s1214_s12, %s1046_s30  ;;  %p1052_p13 = scmp.lt.s32.totalorder %s1046_s30, %s1046_s30 }
  0x1d   :  { %p1053_p0 = por %p1052_p13, %p1051_p12 }
  0x1f   :  { %p1054_p1 = pnand %p1053_p0, %p1047_p11 }
  0x21   :  { %1057 = shalt.err (!%p1054_p1)
}
  0x22   :  { %s1156_s1 = smov 64   ;;  %s1157_s10 = smov 4  }
  0x23   :  { %61 = dma.hbm_to_vmem [thread:$0]  %s1387_s4, 256, %s1214_s12, [#allocation9], %s1156_s1, %s1156_s1, %s1157_s10  }
  0x24   :  { %s1158_s14 = smov [#allocation2]   ;;  %s1159_s16 = smov [#allocation7]  }
  0x25   :  { %s24_s15 = sshll.u32 %s1158_s14, 4  ;;  %s44_s17 = sshll.u32 %s1159_s16, 4  ;;  %s25_s15 = int_to_ptr.vmem [resolvable:$true] %s24_s15  ;;  %s45_s17 = int_to_ptr.vmem [resolvable:$true] %s44_s17 }
  0x26   :  { %s1058_s20 = scalar_lea.hbm %s1383_s0, 128 }
  0x27   :  { %p1059_p2 = scmp.ne.s32.totalorder %s1383_s0, %s1058_s20  ;;  %p1062_p3 = scmp.lt.u32.totalorder %s1058_s20, %s1383_s0 }
  0x29   :  { %p1064_p4 = pnand %p1062_p3, %p1059_p2 }
  0x2b   :  { %1067 = shalt.err (!%p1064_p4)
}
  0x2c   :  { %s1068_s4 = scalar_lea.vmem %s25_s15, 128  ;;  %p1073_p6 = scmp.lt.s32.totalorder %s25_s15, %s25_s15 }
  0x2d   :  { %p1069_p5 = scmp.ne.s32.totalorder %s25_s15, %s1068_s4  ;;  %p1074_p7 = scmp.lt.s32.totalorder %s1068_s4, %s1068_s4 }
  0x2f   :  { %p1075_p8 = por %p1074_p7, %p1073_p6 }
  0x31   :  { %p1076_p9 = pnand %p1075_p8, %p1069_p5 }
  0x33   :  { %1079 = shalt.err (!%p1076_p9)
}
  0x34   :  { %27 = dma.hbm_to_vmem [thread:$0]  %s1383_s0, 128, %s25_s15, [#allocation3]  }
  0x35   :  { %s1080_s28 = scalar_lea.hbm %s1385_s2, 64 }
  0x36   :  { %p1081_p10 = scmp.ne.s32.totalorder %s1385_s2, %s1080_s28  ;;  %p1084_p11 = scmp.lt.u32.totalorder %s1080_s28, %s1385_s2 }
  0x38   :  { %p1086_p12 = pnand %p1084_p11, %p1081_p10 }
  0x3a   :  { %1089 = shalt.err (!%p1086_p12)
}
  0x3b   :  { %s1090_s14 = scalar_lea.vmem %s45_s17, 64  ;;  %p1095_p0 = scmp.lt.s32.totalorder %s45_s17, %s45_s17 }
  0x3c   :  { %p1091_p13 = scmp.ne.s32.totalorder %s45_s17, %s1090_s14  ;;  %p1096_p1 = scmp.lt.s32.totalorder %s1090_s14, %s1090_s14 }
  0x3e   :  { %p1097_p2 = por %p1096_p1, %p1095_p0 }
  0x40   :  { %p1098_p3 = pnand %p1097_p2, %p1091_p13 }
  0x42   :  { %1101 = shalt.err (!%p1098_p3)
}
  0x43   :  { %47 = dma.hbm_to_vmem [thread:$0]  %s1385_s2, 64, %s45_s17, [#allocation6]  }
  0x44   :  { %s1160_s16 = smov [#allocation10]   ;;  %s1102_s21 = scalar_lea.hbm %s1390_s7, 1792 }
  0x45   :  { %s71_s18 = sshll.u32 %s1160_s16, 4  ;;  %p1103_p4 = scmp.ne.s32.totalorder %s1390_s7, %s1102_s21  ;;  %s72_s18 = int_to_ptr.vmem [resolvable:$true] %s71_s18 }
  0x46   :  { %p1106_p5 = scmp.lt.u32.totalorder %s1102_s21, %s1390_s7 }
  0x48   :  { %p1108_p6 = pnand %p1106_p5, %p1103_p4 }
  0x4a   :  { %1111 = shalt.err (!%p1108_p6)
}
  0x4b   :  { %s1112_s12 = scalar_lea.vmem %s72_s18, 1792  ;;  %p1117_p8 = scmp.lt.s32.totalorder %s72_s18, %s72_s18 }
  0x4c   :  { %p1113_p7 = scmp.ne.s32.totalorder %s72_s18, %s1112_s12  ;;  %p1118_p9 = scmp.lt.s32.totalorder %s1112_s12, %s1112_s12 }
  0x4e   :  { %p1119_p10 = por %p1118_p9, %p1117_p8 }
  0x50   :  { %p1120_p11 = pnand %p1119_p10, %p1113_p7 }
  0x52   :  { %1123 = shalt.err (!%p1120_p11)
}
  0x53   :  { %77 = dma.hbm_to_vmem [thread:$0]  %s1390_s7, 1792, %s72_s18, [#allocation9], %s1156_s1, %s1156_s1, %s1157_s10  }
  0x54   :  { %1146 = dma.done.wait [#allocation3], 128  }
  0x55   :  { %1147 = vsyncadd [#allocation3], 4294967168 }
  0x56   :  { %1148 = dma.done.wait [#allocation6], 192  }
  0x57   :  { %1149 = vsyncadd [#allocation6], 4294967104 }
  0x58   :  { %1150 = dma.done.wait [#allocation9], 2048  }
  0x59   :  { %1151 = vsyncadd [#allocation9], 4294965248  ;;  %v1161_v0 = vmov 0.0   ;;  %vm1162_vm0 = vmmov 0   ;;  %vm126_vm1 = vcmask 1043456   ;;  %v112_v2 = vld [vmem:[#allocation5] sm:$0xff] }
  0x5a   :  { %904 = vmatprep.subr.bf16.mxu0 %v1161_v0  ;;  %906 = vmatprep.mubr.msk.bf16.mxu0 %vm1162_vm0, %v1161_v0  ;;  %v114_v1 = vld [vmem:[#allocation7] sm:$0xf]  ;;  %v96_v3 = vld [vmem:[#allocation2] sm:$0xff]  ;;  %vm98_vm2 = vcmask 261120   ;;  %v113_v5 = vpack.c.bf16 %v112_v2, %v112_v2  ;;  %vm122_vm3 = vcmask 64512   ;;  %v992_v20 = vld [vmem:[#allocation8] sm:$0xff]  }
  0x5b   :  { %910 = vmatprep.subr.bf16.mxu1 %v1161_v0  ;;  %914 = vmatprep.mubr.msk.bf16.mxu1 %vm1162_vm0, %v1161_v0  ;;  %v128_v4 = vsel %vm126_vm1, %v114_v1, 0  ;;  %v97_v6 = vmul.f32 %v96_v3, %v96_v3  ;;  %v832_v8 = vld [vmem:[%s1386_s3] ss:$0 sm:$0xff]  ;;  %v993_v23 = vld [vmem:[#allocation8 + $0x8] sm:$0xff]   ;;  %v996_v36 = vld [vmem:[#allocation10] sm:$0xff]   ;;  %s1163_s22 = smov [#allocation11]  }
  0x5c   :  { %905 = vmatpush3.bf16.msra.mxu0 %v128_v4  ;;  %v994_v21 = vld [vmem:[%s1388_s5] sm:$0xff]   ;;  %v995_v24 = vld [vmem:[%s1388_s5 + $0x8] sm:$0xff]   ;;  %v1000_v61 = vld [vmem:[#allocation10 + $0x20] sm:$0xff]   ;;  %s821_s23 = sshll.u32 %s1163_s22, 4  ;;  %s822_s23 = int_to_ptr.vmem [resolvable:$true] %s821_s23 }
  0x5d   :  { %v99_v7 = vsel %vm98_vm2, %v97_v6, 0.0  ;;  %918 = vmatprep.subr.bf16.mxu0 %v1161_v0  ;;  %911 = vmatpush3.bf16.msra.mxu1 %v994_v21  ;;  %v997_v37 = vld [vmem:[#allocation10 + $0x8] sm:$0xff]   ;;  %v998_v49 = vld [vmem:[#allocation10 + $0x10] sm:$0xff]   ;;  %v999_v50 = vld [vmem:[#allocation10 + $0x18] sm:$0xff]   ;;  %s1124_s24 = scalar_lea.vmem %s822_s23, 128  ;;  %p1129_p13 = scmp.lt.s32.totalorder %s822_s23, %s822_s23 }
  0x5e   :  { %100 = vadd.xlane.f32.xlu0 %v99_v7  ;;  %912 = vmatprep.subr.bf16.mxu1 %v1161_v0  ;;  %v840_v39 = vld [vmem:[%s1389_s6] ss:$0 sm:$0xff]  ;;  %v846_v63 = vld [vmem:[%s1391_s8 + $0x1] ss:$0 sm:$0xff]  ;;  %p1125_p12 = scmp.ne.s32.totalorder %s822_s23, %s1124_s24  ;;  %p1130_p0 = scmp.lt.s32.totalorder %s1124_s24, %s1124_s24 }
  0x5f   :  { %907 = vmatmul.mubr.msk.bf16.vlgmr.msra.gmra.mrb[0].mxu0 %vm122_vm3, %v113_v5  ;;  %v841_v51 = vld [vmem:[%s1391_s8] ss:$0 sm:$0xff] }
  0x60   :  { %922 = vmatprep.mubr.msk.bf16.mxu0 %vm1162_vm0, %v1161_v0  ;;  %919 = vmatpush3.bf16.msra.mxu0 %v992_v20  ;;  %v1001_v62 = vld [vmem:[#allocation10 + $0x28] sm:$0xff]   ;;  %p1131_p1 = por %p1130_p0, %p1129_p13 }
  0x61   :  { %920 = vmatprep.subr.bf16.mxu0 %v1161_v0  ;;  %913 = vmatpush3.bf16.msra.mxu1 %v995_v24  ;;  %v856_v24 = vld [vmem:[%s1391_s8 + $0x3] ss:$0 sm:$0xff] }
  0x62   :  { %926 = vmatprep.subr.bf16.mxu1 %v1161_v0  ;;  %p1132_p2 = pnand %p1131_p1, %p1125_p12 }
  0x64   :  { %921 = vmatpush3.bf16.msra.mxu0 %v993_v23  ;;  %v1005_v23 = vld [vmem:[#allocation10 + $0x48] sm:$0xff]  }
  0x65   :  { %934 = vmatprep.subr.bf16.mxu0 %v1161_v0 }
  0xeb   :  { %v101_v10 = vpop.xlane.xlu0 %100 }
  0xec   :  { %v103_v16 = vmul.f32 0.03125, %v101_v10  ;;  %v1002_v10 = vld [vmem:[#allocation10 + $0x30] sm:$0xff]  }
  0xee   :  { %v104_v18 = vadd.f32 1e-08, %v103_v16 }
  0xf0   :  { %1010 = vrsqrt.f32 %v104_v18 }
  0xfa   :  { %v1011_v19 = vpop.eup %1010 }
  0xfb   :  { %v106_v22 = vmul.f32 %v1011_v19, %v96_v3 }
  0xfd   :  { %v107_v25 = vpack.c.bf16 %v106_v22, %v106_v22  ;;  %v1004_v22 = vld [vmem:[#allocation10 + $0x40] sm:$0xff]  }
  0xff   :  { %923 = vmatmul.mubr.msk.bf16.vlgmr.msra.gmra.mrb[4].mxu0 %vm98_vm2, %v107_v25 }
 0x100   :  { %938 = vmatprep.mubr.msk.bf16.mxu0 %vm1162_vm0, %v1161_v0  ;;  %935 = vmatpush3.bf16.msra.mxu0 %v998_v49 }
 0x101   :  { %936 = vmatprep.subr.bf16.mxu0 %v1161_v0 }
 0x104   :  { %937 = vmatpush3.bf16.msra.mxu0 %v999_v50 }
 0x105   :  { %950 = vmatprep.subr.bf16.mxu0 %v1161_v0 }
 0x132   :  { %v164_v9 = vpop.f32.mrb[0].mxu0 }
 0x133   :  { %v165_v11 = vadd.f32 %v832_v8, %v164_v9  ;;  %v908_v12 = vpop.f32.mrb[1].mxu0 }
 0x134   :  { %v167_v13 = vpop.f32.mrb[2].mxu0  ;;  %v851_v12 = vld [vmem:[%s1391_s8 + $0x2] ss:$0 sm:$0xff] }
 0x135   :  { %v909_v14 = vpop.f32.mrb[3].mxu0  ;;  %v170_v15 = vmul.f32 %v165_v11, %v165_v11 }
 0x137   :  { %v171_v17 = vsel %vm98_vm2, %v170_v15, 0.0 }
 0x138   :  { %172 = vadd.xlane.f32.xlu0 %v171_v17 }
 0x1c5   :  { %v173_v26 = vpop.xlane.xlu0 %172 }
 0x1c6   :  { %v174_v27 = vmul.f32 0.03125, %v173_v26 }
 0x1c8   :  { %v175_v28 = vadd.f32 1e-08, %v174_v27 }
 0x1ca   :  { %1012 = vrsqrt.f32 %v175_v28 }
 0x1d2   :  { %v287_v32 = vpop.f32.mrb[4].mxu0 }
 0x1d3   :  { %v924_v33 = vpop.f32.mrb[5].mxu0 }
 0x1d4   :  { %v1013_v29 = vpop.eup %1012  ;;  %v290_v34 = vpop.f32.mrb[6].mxu0 }
 0x1d5   :  { %v177_v30 = vmul.f32 %v1013_v29, %v165_v11  ;;  %v925_v35 = vpop.f32.mrb[7].mxu0  ;;  %v1003_v11 = vld [vmem:[#allocation10 + $0x38] sm:$0xff]   ;;  %v1006_v34 = vld [vmem:[#allocation10 + $0x50] sm:$0xff]  }
 0x1d6   :  { %v1007_v35 = vld [vmem:[#allocation10 + $0x58] sm:$0xff]  }
 0x1d7   :  { %v178_v31 = vpack.c.bf16 %v177_v30, %v177_v30 }
 0x1d9   :  { %915 = vmatmul.mubr.msk.bf16.vlgmr.msra.gmra.mrb[0].mxu1 %vm98_vm2, %v178_v31 }
 0x1da   :  { %930 = vmatprep.mubr.msk.bf16.mxu1 %vm1162_vm0, %v1161_v0  ;;  %927 = vmatpush3.bf16.msra.mxu1 %v996_v36  ;;  %v861_v36 = vld [vmem:[%s1391_s8 + $0x4] ss:$0 sm:$0xff] }
 0x1db   :  { %928 = vmatprep.subr.bf16.mxu1 %v1161_v0 }
 0x1de   :  { %929 = vmatpush3.bf16.msra.mxu1 %v997_v37 }
 0x1df   :  { %942 = vmatprep.subr.bf16.mxu1 %v1161_v0 }
 0x2ac   :  { %v232_v38 = vpop.f32.mrb[0].mxu1 }
 0x2ad   :  { %v288_v40 = vadd.f32 %v287_v32, %v232_v38  ;;  %v916_v41 = vpop.f32.mrb[1].mxu1 }
 0x2ae   :  { %v235_v42 = vpop.f32.mrb[2].mxu1 }
 0x2af   :  { %v300_v43 = vadd.f32 %v840_v39, %v288_v40  ;;  %v917_v44 = vpop.f32.mrb[3].mxu1 }
 0x2b1   :  { %vm301_vm4 = vcmp.ge.f32.partialorder %v300_v43, 0.0  ;;  %v302_v45 = vmul.f32 0.2, %v300_v43 }
 0x2b3   :  { %v303_v46 = vsel %vm301_vm4, %v300_v43, %v302_v45 }
 0x2b4   :  { %v304_v47 = vmul.f32 1.4142135, %v303_v46  ;;  %v1008_v46 = vld [vmem:[#allocation10 + $0x60] sm:$0xff]  }
 0x2b6   :  { %v310_v48 = vpack.c.bf16 %v304_v47, %v304_v47  ;;  %v1009_v47 = vld [vmem:[#allocation10 + $0x68] sm:$0xff]  }
 0x2b8   :  { %931 = vmatmul.mubr.msk.bf16.vlgmr.msra.gmra.mrb[4].mxu1 %vm98_vm2, %v310_v48  ;;  %v866_v48 = vld [vmem:[%s1391_s8 + $0x5] ss:$0 sm:$0xff] }
 0x2b9   :  { %946 = vmatprep.mubr.msk.bf16.mxu1 %vm1162_vm0, %v1161_v0  ;;  %943 = vmatpush3.bf16.msra.mxu1 %v1000_v61 }
 0x2ba   :  { %944 = vmatprep.subr.bf16.mxu1 %v1161_v0 }
 0x2bd   :  { %945 = vmatpush3.bf16.msra.mxu1 %v1001_v62 }
 0x2be   :  { %958 = vmatprep.subr.bf16.mxu1 %v1161_v0 }
 0x38b   :  { %v366_v52 = vpop.f32.mrb[4].mxu1 }
 0x38c   :  { %v367_v53 = vadd.f32 %v841_v51, %v366_v52  ;;  %v932_v54 = vpop.f32.mrb[5].mxu1 }
 0x38d   :  { %v369_v55 = vpop.f32.mrb[6].mxu1 }
 0x38e   :  { %vm372_vm5 = vcmp.ge.f32.partialorder %v367_v53, 0.0  ;;  %v373_v56 = vmul.f32 0.2, %v367_v53  ;;  %v933_v57 = vpop.f32.mrb[7].mxu1 }
 0x390   :  { %v374_v58 = vsel %vm372_vm5, %v367_v53, %v373_v56 }
 0x391   :  { %v375_v59 = vmul.f32 1.4142135, %v374_v58 }
 0x393   :  { %v383_v60 = vpack.c.bf16 %v375_v59, %v375_v59 }
 0x395   :  { %939 = vmatmul.mubr.msk.bf16.vlgmr.msra.gmra.mrb[8].mxu0 %vm98_vm2, %v383_v60 }
 0x396   :  { %954 = vmatprep.mubr.msk.bf16.mxu0 %vm1162_vm0, %v1161_v0  ;;  %951 = vmatpush3.bf16.msra.mxu0 %v1002_v10 }
 0x397   :  { %952 = vmatprep.subr.bf16.mxu0 %v1161_v0 }
 0x39a   :  { %953 = vmatpush3.bf16.msra.mxu0 %v1003_v11 }
 0x39b   :  { %966 = vmatprep.subr.bf16.mxu0 %v1161_v0 }
 0x468   :  { %v439_v1 = vpop.f32.mrb[8].mxu0 }
 0x469   :  { %v440_v2 = vadd.f32 %v846_v63, %v439_v1  ;;  %v940_v3 = vpop.f32.mrb[9].mxu0 }
 0x46a   :  { %v442_v4 = vpop.f32.mrb[10].mxu0 }
 0x46b   :  { %vm445_vm6 = vcmp.ge.f32.partialorder %v440_v2, 0.0  ;;  %v446_v5 = vmul.f32 0.2, %v440_v2  ;;  %v941_v6 = vpop.f32.mrb[11].mxu0 }
 0x46d   :  { %v447_v7 = vsel %vm445_vm6, %v440_v2, %v446_v5 }
 0x46e   :  { %v448_v8 = vmul.f32 1.4142135, %v447_v7 }
 0x470   :  { %v456_v9 = vpack.c.bf16 %v448_v8, %v448_v8 }
 0x472   :  { %947 = vmatmul.mubr.msk.bf16.vlgmr.msra.gmra.mrb[8].mxu1 %vm98_vm2, %v456_v9 }
 0x473   :  { %962 = vmatprep.mubr.msk.bf16.mxu1 %vm1162_vm0, %v1161_v0  ;;  %959 = vmatpush3.bf16.msra.mxu1 %v1004_v22 }
 0x474   :  { %960 = vmatprep.subr.bf16.mxu1 %v1161_v0 }
 0x477   :  { %961 = vmatpush3.bf16.msra.mxu1 %v1005_v23 }
 0x478   :  { %974 = vmatprep.subr.bf16.mxu1 %v1161_v0 }
 0x545   :  { %v512_v13 = vpop.f32.mrb[8].mxu1 }
 0x546   :  { %v513_v14 = vadd.f32 %v851_v12, %v512_v13  ;;  %v948_v15 = vpop.f32.mrb[9].mxu1 }
 0x547   :  { %v515_v16 = vpop.f32.mrb[10].mxu1 }
 0x548   :  { %vm518_vm7 = vcmp.ge.f32.partialorder %v513_v14, 0.0  ;;  %v519_v17 = vmul.f32 0.2, %v513_v14  ;;  %v949_v18 = vpop.f32.mrb[11].mxu1 }
 0x54a   :  { %v520_v19 = vsel %vm518_vm7, %v513_v14, %v519_v17 }
 0x54b   :  { %v521_v20 = vmul.f32 1.4142135, %v520_v19 }
 0x54d   :  { %v529_v21 = vpack.c.bf16 %v521_v20, %v521_v20 }
 0x54f   :  { %955 = vmatmul.mubr.msk.bf16.vlgmr.msra.gmra.mrb[12].mxu0 %vm98_vm2, %v529_v21 }
 0x550   :  { %970 = vmatprep.mubr.msk.bf16.mxu0 %vm1162_vm0, %v1161_v0  ;;  %967 = vmatpush3.bf16.msra.mxu0 %v1006_v34 }
 0x551   :  { %968 = vmatprep.subr.bf16.mxu0 %v1161_v0 }
 0x554   :  { %969 = vmatpush3.bf16.msra.mxu0 %v1007_v35 }
 0x622   :  { %v585_v25 = vpop.f32.mrb[12].mxu0 }
 0x623   :  { %v586_v26 = vadd.f32 %v856_v24, %v585_v25  ;;  %v956_v27 = vpop.f32.mrb[13].mxu0 }
 0x624   :  { %v588_v28 = vpop.f32.mrb[14].mxu0 }
 0x625   :  { %vm591_vm8 = vcmp.ge.f32.partialorder %v586_v26, 0.0  ;;  %v592_v29 = vmul.f32 0.2, %v586_v26  ;;  %v957_v30 = vpop.f32.mrb[15].mxu0 }
 0x627   :  { %v593_v31 = vsel %vm591_vm8, %v586_v26, %v592_v29 }
 0x628   :  { %v594_v32 = vmul.f32 1.4142135, %v593_v31 }
 0x62a   :  { %v602_v33 = vpack.c.bf16 %v594_v32, %v594_v32 }
 0x62c   :  { %963 = vmatmul.mubr.msk.bf16.vlgmr.msra.gmra.mrb[12].mxu1 %vm98_vm2, %v602_v33 }
 0x62d   :  { %978 = vmatprep.mubr.msk.bf16.mxu1 %vm1162_vm0, %v1161_v0  ;;  %975 = vmatpush3.bf16.msra.mxu1 %v1008_v46 }
 0x62e   :  { %976 = vmatprep.subr.bf16.mxu1 %v1161_v0  ;;  %v871_v0 = vld [vmem:[%s1391_s8 + $0x6] ss:$0 sm:$0xff] }
 0x631   :  { %977 = vmatpush3.bf16.msra.mxu1 %v1009_v47 }
 0x6ff   :  { %v658_v37 = vpop.f32.mrb[12].mxu1 }
 0x700   :  { %v659_v38 = vadd.f32 %v861_v36, %v658_v37  ;;  %v964_v39 = vpop.f32.mrb[13].mxu1 }
 0x701   :  { %v661_v40 = vpop.f32.mrb[14].mxu1 }
 0x702   :  { %vm664_vm9 = vcmp.ge.f32.partialorder %v659_v38, 0.0  ;;  %v665_v41 = vmul.f32 0.2, %v659_v38  ;;  %v965_v42 = vpop.f32.mrb[15].mxu1 }
 0x704   :  { %v666_v43 = vsel %vm664_vm9, %v659_v38, %v665_v41 }
 0x705   :  { %v667_v44 = vmul.f32 1.4142135, %v666_v43 }
 0x707   :  { %v675_v45 = vpack.c.bf16 %v667_v44, %v667_v44 }
 0x709   :  { %971 = vmatmul.mubr.msk.bf16.vlgmr.msra.gmra.mrb[16].mxu0 %vm98_vm2, %v675_v45 }
 0x7dc   :  { %v731_v49 = vpop.f32.mrb[16].mxu0 }
 0x7dd   :  { %v732_v50 = vadd.f32 %v866_v48, %v731_v49  ;;  %v972_v51 = vpop.f32.mrb[17].mxu0 }
 0x7de   :  { %v734_v52 = vpop.f32.mrb[18].mxu0 }
 0x7df   :  { %vm737_vm10 = vcmp.ge.f32.partialorder %v732_v50, 0.0  ;;  %v738_v53 = vmul.f32 0.2, %v732_v50  ;;  %v973_v54 = vpop.f32.mrb[19].mxu0 }
 0x7e1   :  { %v739_v55 = vsel %vm737_vm10, %v732_v50, %v738_v53 }
 0x7e2   :  { %v740_v56 = vmul.f32 1.4142135, %v739_v55 }
 0x7e4   :  { %v748_v57 = vpack.c.bf16 %v740_v56, %v740_v56 }
 0x7e6   :  { %979 = vmatmul.mubr.msk.bf16.vlgmr.msra.gmra.mrb[16].mxu1 %vm98_vm2, %v748_v57 }
 0x8b9   :  { %v804_v58 = vpop.f32.mrb[16].mxu1 }
 0x8ba   :  { %v805_v59 = vadd.f32 %v871_v0, %v804_v58  ;;  %v980_v60 = vpop.f32.mrb[17].mxu1 }
 0x8bb   :  { %v807_v61 = vpop.f32.mrb[18].mxu1 }
 0x8bc   :  { %vm810_vm11 = vcmp.ge.f32.partialorder %v805_v59, 0.0  ;;  %v811_v62 = vmul.f32 0.2, %v805_v59  ;;  %v981_v63 = vpop.f32.mrb[19].mxu1 }
 0x8be   :  { %v812_v1 = vsel %vm810_vm11, %v805_v59, %v811_v62 }
 0x8bf   :  { %v813_v2 = vmul.f32 1.4142135, %v812_v1 }
 0x8c1   :  { %814 = vst.msk [vmem:[#allocation11] sm:$0xff] %vm98_vm2, %v813_v2 }
 0x8c2   :  { %1135 = shalt.err (!%p1132_p2)
}
 0x8c3   :  { %s1136_s12 = scalar_lea.hbm %s1392_s9, 128 }
 0x8c4   :  { %p1137_p3 = scmp.ne.s32.totalorder %s1392_s9, %s1136_s12  ;;  %p1140_p4 = scmp.lt.u32.totalorder %s1136_s12, %s1392_s9 }
 0x8c6   :  { %p1142_p5 = pnand %p1140_p4, %p1137_p3 }
 0x8c8   :  { %1145 = shalt.err (!%p1142_p5)
}
 0x8c9   :  { %824 = dma.vmem_to_hbm [thread:$0]  %s822_s23, 128, %s1392_s9, [#allocation4]  }
 0x8ca   :  { %1152 = dma.done.wait [#allocation4], 128  }
 0x8cb   :  { %1153 = vsyncadd [#allocation4], 4294967168 }
 0x8cc   :  { %828 = vsyncpa [#allocation3], 1 }
 0x8cd   :  { %829 = vsyncpa [#allocation6], 1 }
 0x8ce   :  { %830 = vsyncpa [#allocation9], 1 }
 0x8cf   :  { %831 = vsyncpa [#allocation4], 1 }

</bundles_post_ra>
